<compile_context>
chip_gen: v7x
topology: tpu7x:2x2x1
jax: 0.10.0
libtpu: 0.0.40
codegen_flags: <defaults>
</compile_context>

<pallas_src>
import jax
import jax.numpy as jnp
from jax.experimental import pallas as pl
from jax.experimental.pallas import tpu as pltpu
from math import log2, comb, prod


def _round_up(x, m):
    return (x + m - 1) // m * m


_VMEM_LIMIT = 32 * 1024 * 1024  # safe on v5e/v6e/v7x; well above what we use.


# ----------------------------------------------------------------------------
# Kernel A: tiled  Y[o, m] = act(sum_k W[o, k] * X[k, m] + b[o])
# ----------------------------------------------------------------------------
def _mm_kernel(act):
    def kernel(w_ref, x_ref, b_ref, o_ref, acc_ref):
        k = pl.program_id(1)

        @pl.when(k == 0)
        def _init():
            acc_ref[...] = jnp.zeros_like(acc_ref)

        acc_ref[...] += jnp.dot(w_ref[...], x_ref[...],
                                preferred_element_type=jnp.float32)

        @pl.when(k == pl.num_programs(1) - 1)
        def _finalize():
            y = acc_ref[...] + b_ref[...]
            if act == "leaky":                      # F.leaky_relu, slope 0.01
                y = jnp.where(y >= 0, y, 0.01 * y)
            elif act == "relu":
                # torch does relu_() followed by leaky_relu; the leaky pass is
                # a mathematical no-op after relu, so a single max suffices.
                y = jnp.maximum(y, 0.0)
            o_ref[...] = y.astype(o_ref.dtype)

    return kernel


def matmul_bias(w, x, b, act="none", out_dtype=jnp.float32,
                tile_m=512, tile_k=512):
    """W: (O, K) f32, X: (K, M), b: (O,) f32 -> (O, M).  bf16 MXU, f32 acc."""
    O, K = w.shape
    K2, M = x.shape
    assert K == K2 and b.shape == (O,)

    # K tiling: the weight block's lane dim is tk, so tk must be a multiple of
    # 128 unless it covers the whole (padded) K.
    K_pad = _round_up(K, 8)
    if K_pad > tile_k:
        tk = tile_k                                  # multiple of 128
        K_pad = _round_up(K, tk)
    else:
        tk = K_pad                                   # single full-K block
    tm = min(tile_m, _round_up(M, 128))              # lane-dense output tiles
    M_pad = _round_up(M, tm)

    wp = jnp.pad(w, ((0, 0), (0, K_pad - K))).astype(jnp.bfloat16)
    xp = jnp.pad(x, ((0, K_pad - K), (0, M_pad - M))).astype(jnp.bfloat16)
    bp = b.reshape(O, 1).astype(jnp.float32)

    grid = (M_pad // tm, K_pad // tk)
    out_bytes = O * M_pad * jnp.dtype(out_dtype).itemsize
    cost = pl.CostEstimate(
        flops=2 * O * K_pad * M_pad, transcendentals=0,
        bytes_accessed=2 * (wp.size + xp.size) + 4 * bp.size + out_bytes)

    out = pl.pallas_call(
        _mm_kernel(act),
        out_shape=jax.ShapeDtypeStruct((O, M_pad), out_dtype),
        grid_spec=pltpu.PrefetchScalarGridSpec(
            num_scalar_prefetch=0,
            grid=grid,
            in_specs=[
                pl.BlockSpec((O, tk), lambda m, k: (0, k)),   # weights
                pl.BlockSpec((tk, tm), lambda m, k: (k, m)),  # patches
                pl.BlockSpec((O, 1), lambda m, k: (0, 0)),    # bias (resident)
            ],
            out_specs=pl.BlockSpec((O, tm), lambda m, k: (0, m)),
            scratch_shapes=[pltpu.VMEM((O, tm), jnp.float32)],
        ),
        compiler_params=pltpu.CompilerParams(
            dimension_semantics=("parallel", "arbitrary"),
            vmem_limit_bytes=_VMEM_LIMIT),
        cost_estimate=cost,
    )(wp, xp, bp)
    return out[:, :M]


# ----------------------------------------------------------------------------
# Kernel B: grouped projection conv (ConvIndexer.proj) as per-group matmuls
# ----------------------------------------------------------------------------
def _grouped_mm_kernel(groups):
    def kernel(x_ref, w_ref, b_ref, o_ref):
        for g in range(groups):                     # static unroll, groups small
            y = jnp.dot(w_ref[g], x_ref[g], preferred_element_type=jnp.float32)
            o_ref[g] = (y + b_ref[g]).astype(o_ref.dtype)
    return kernel


def grouped_conv_proj(x, wg, b, f, stride, groups,
                      out_dtype=jnp.float32, tile_m=512):
    """x: (C, B, H, W), wg: torch grouped layout (C_out, m_in, f, f).

    Returns (groups, m_out, B*OH*OW) — already the layout the top-k wants."""
    C, B, H, W = x.shape
    C_out, m_in, f1, f2 = wg.shape
    assert f1 == f and f2 == f and C == groups * m_in
    m_out = C_out // groups
    OH = (H - f) // stride + 1
    OW = (W - f) // stride + 1
    M = B * OH * OW

    taps = []
    for kh in range(f):
        for kw in range(f):
            taps.append(x[:, :, kh:kh + (OH - 1) * stride + 1:stride,
                                kw:kw + (OW - 1) * stride + 1:stride])
    tp = jnp.stack(taps, axis=0).reshape(f * f, groups, m_in, M)
    tp = jnp.transpose(tp, (1, 0, 2, 3)).reshape(groups, f * f * m_in, M)

    wr = wg.reshape(groups, m_out, m_in, f, f)
    wr = jnp.transpose(wr, (0, 1, 3, 4, 2)).reshape(groups, m_out, f * f * m_in)

    Kg = f * f * m_in
    tm = min(tile_m, _round_up(M, 128))
    M_pad = _round_up(M, tm)
    tp = jnp.pad(tp, ((0, 0), (0, 0), (0, M_pad - M))).astype(jnp.bfloat16)
    wr = wr.astype(jnp.bfloat16)
    bp = b.reshape(groups, m_out, 1).astype(jnp.float32)

    out = pl.pallas_call(
        _grouped_mm_kernel(groups),
        out_shape=jax.ShapeDtypeStruct((groups, m_out, M_pad), out_dtype),
        grid_spec=pltpu.PrefetchScalarGridSpec(
            num_scalar_prefetch=0,
            grid=(M_pad // tm,),
            in_specs=[
                pl.BlockSpec((groups, Kg, tm), lambda m: (0, 0, m)),
                pl.BlockSpec((groups, m_out, Kg), lambda m: (0, 0, 0)),
                pl.BlockSpec((groups, m_out, 1), lambda m: (0, 0, 0)),
            ],
            out_specs=pl.BlockSpec((groups, m_out, tm), lambda m: (0, 0, m)),
        ),
        compiler_params=pltpu.CompilerParams(
            dimension_semantics=("parallel",),
            vmem_limit_bytes=_VMEM_LIMIT),
        cost_estimate=pl.CostEstimate(
            flops=2 * groups * m_out * Kg * M_pad, transcendentals=0,
            bytes_accessed=2 * (tp.size + wr.size) + 4 * bp.size
            + groups * m_out * M_pad * jnp.dtype(out_dtype).itemsize),
    )(tp, wr, bp)
    return out[:, :, :M]


# ----------------------------------------------------------------------------
# Kernel C: double top-k (pos / neg) along axis 0 of a (C, N) matrix, N-tiled
# ----------------------------------------------------------------------------
def _topk_kernel(k):
    def kernel(x_ref, pv_ref, pi_ref, nv_ref, ni_ref):
        x = x_ref[...]
        C = x.shape[0]
        iota = jax.lax.broadcasted_iota(jnp.int32, x.shape, 0)
        neg_inf = jnp.float32(-jnp.inf)
        xp, xn = x, -x
        pvs, pis, nvs, nis = [], [], [], []
        for _ in range(k):
            mp = jnp.max(xp, axis=0, keepdims=True)
            # Ties: first occurrence (matches our previous behaviour; torch's
            # ordering for exact duplicates is unspecified).
            ip = jnp.min(jnp.where(xp == mp, iota, C), axis=0, keepdims=True)
            pvs.append(mp)
            pis.append(ip)
            xp = jnp.where(iota == ip, neg_inf, xp)

            mn = jnp.max(xn, axis=0, keepdims=True)
            im = jnp.min(jnp.where(xn == mn, iota, C), axis=0, keepdims=True)
            nvs.append(-mn)                          # torch stores -topk(-x).values
            nis.append(im)
            xn = jnp.where(iota == im, neg_inf, xn)
        pv_ref[...] = jnp.concatenate(pvs, axis=0)
        pi_ref[...] = jnp.concatenate(pis, axis=0)
        nv_ref[...] = jnp.concatenate(nvs, axis=0)
        ni_ref[...] = jnp.concatenate(nis, axis=0)
    return kernel


def topk_pos_neg(flat, k, tile_n=512):
    C, N = flat.shape
    tn = min(tile_n, _round_up(N, 128))
    N_pad = _round_up(N, tn)
    xf = jnp.pad(flat.astype(jnp.float32), ((0, 0), (0, N_pad - N)))
    o_spec = pl.BlockSpec((k, tn), lambda n: (0, n))
    pv, pi, nv, ni = pl.pallas_call(
        _topk_kernel(k),
        out_shape=(jax.ShapeDtypeStruct((k, N_pad), jnp.float32),
                   jax.ShapeDtypeStruct((k, N_pad), jnp.int32),
                   jax.ShapeDtypeStruct((k, N_pad), jnp.float32),
                   jax.ShapeDtypeStruct((k, N_pad), jnp.int32)),
        grid_spec=pltpu.PrefetchScalarGridSpec(
            num_scalar_prefetch=0,
            grid=(N_pad // tn,),
            in_specs=[pl.BlockSpec((C, tn), lambda n: (0, n))],
            out_specs=(o_spec, o_spec, o_spec, o_spec),
        ),
        compiler_params=pltpu.CompilerParams(
            dimension_semantics=("parallel",),
            vmem_limit_bytes=_VMEM_LIMIT),
    )(xf)
    return pv[:, :N], pi[:, :N], nv[:, :N], ni[:, :N]


# ----------------------------------------------------------------------------
# Conv2d in (C, B, H, W) layout = bf16 im2col + Pallas matmul (+ fused 1x1 res)
# ----------------------------------------------------------------------------
def conv2d_cf(x, w, b, stride, padding, act="none", out_dtype=jnp.bfloat16,
              res_x=None, res_wb=None):
    C, B, H, W = x.shape
    O, C2, KH, KW = w.shape
    assert C == C2
    xp = jnp.pad(x, ((0, 0), (0, 0), (padding, padding), (padding, padding)))
    Hp, Wp = H + 2 * padding, W + 2 * padding
    OH = (Hp - KH) // stride + 1
    OW = (Wp - KW) // stride + 1
    M = B * OH * OW

    # TODO(synk): the im2col tap stack is still materialised by XLA glue (in
    # bf16); a fully fused direct conv (kh/kw loop inside the kernel over a
    # halo'd input block) would remove the KH*KW x HBM read amplification.
    taps = []
    for kh in range(KH):
        for kw in range(KW):
            taps.append(xp[:, :, kh:kh + (OH - 1) * stride + 1:stride,
                                 kw:kw + (OW - 1) * stride + 1:stride])
    patches = jnp.stack(taps, axis=0).reshape(KH * KW * C, M)
    w_mat = jnp.transpose(w, (0, 2, 3, 1)).reshape(O, KH * KW * C)
    bias = b

    if res_x is not None:
        # Fuse the parallel 1x1/stride-`stride` residual conv into the same
        # matmul: it samples res_x at exactly this conv's output grid
        # positions, so it is just extra rows along the reduction (K) axis.
        rw, rb = res_wb
        Cr = res_x.shape[0]
        assert OH == (res_x.shape[2] - 1) // stride + 1
        assert OW == (res_x.shape[3] - 1) // stride + 1
        rx = res_x[:, :, ::stride, ::stride][:, :, :OH, :OW].reshape(Cr, M)
        patches = jnp.concatenate([patches, rx], axis=0)
        w_mat = jnp.concatenate([w_mat, rw.reshape(O, Cr)], axis=1)
        bias = bias + rb

    out = matmul_bias(w_mat, patches, bias, act=act, out_dtype=out_dtype)
    return out.reshape(O, B, OH, OW)


def fold_bn(w, b, bn, eps=1e-5):
    """Fold eval-mode BatchNorm2d (running stats) into the preceding conv."""
    s = bn["gamma"] / jnp.sqrt(bn["var"] + eps)
    return w * s[:, None, None, None], (b - bn["mean"]) * s + bn["beta"]


# ----------------------------------------------------------------------------
# BankEncoder building blocks (residual 1x1 conv fused into the final matmul)
# ----------------------------------------------------------------------------
def down_block_ext(x, p, r):
    h = conv2d_cf(x, p["w3"], p["b3"], stride=1, padding=1, act="leaky")
    h = conv2d_cf(h, p["w5"], p["b5"], stride=1, padding=2)
    w1, b1 = fold_bn(p["w1"], p["b1"], p["bn"])
    return conv2d_cf(h, w1, b1, stride=r, padding=0, act="leaky",
                     res_x=x, res_wb=(p["res_w"], p["res_b"]))


def down_block_int(x, p, r):
    h = conv2d_cf(x, p["w3"], p["b3"], stride=1, padding=1, act="leaky")
    w5, b5 = fold_bn(p["w5"], p["b5"], p["bn"])
    return conv2d_cf(h, w5, b5, stride=r, padding=2, act="relu",
                     res_x=x, res_wb=(p["res_w"], p["res_b"]))


# ----------------------------------------------------------------------------
# Parameter init (deterministic, synthetic, torch layouts)
# ----------------------------------------------------------------------------
class KeyGen:
    def __init__(self, key):
        self.key = key

    def __call__(self):
        self.key, sub = jax.random.split(self.key)
        return sub


def init_bank_encoder_params(key, cfg):
    kg = KeyGen(key)

    def w_(shape):
        return 0.1 * jax.random.normal(kg(), shape, jnp.float32)

    def bn_(c):
        return dict(
            gamma=1.0 + 0.1 * jax.random.normal(kg(), (c,), jnp.float32),
            beta=0.1 * jax.random.normal(kg(), (c,), jnp.float32),
            mean=0.1 * jax.random.normal(kg(), (c,), jnp.float32),
            var=0.5 + jax.random.uniform(kg(), (c,), jnp.float32),
        )

    c_list = cfg["channels_list"]
    r_list = cfg["sampling_ratio_list"]
    nb = len(r_list)
    c_last = c_list[-1]
    c_o, m, f = cfg["num_proj_channels"], cfg["num_code_maps"], cfg["proj_filter_size"]

    p = {"int": [], "ext": []}
    for i in range(nb):
        ci, co = c_list[i], c_list[i + 1]
        p["int"].append(dict(
            res_w=w_((co, ci, 1, 1)), res_b=w_((co,)),
            w3=w_((co, ci, 3, 3)), b3=w_((co,)),
            w5=w_((co, co, 5, 5)), b5=w_((co,)),
            bn=bn_(co)))
        p["ext"].append(dict(
            res_w=w_((c_last, ci, 1, 1)), res_b=w_((c_last,)),
            w3=w_((ci, ci, 3, 3)), b3=w_((ci,)),
            w5=w_((ci, ci, 5, 5)), b5=w_((ci,)),
            w1=w_((c_last, ci, 1, 1)), b1=w_((c_last,)),
            bn=bn_(c_last)))
    p["cc_w"] = w_((c_o * m, c_last * (nb + 1), 1, 1))
    p["cc_b"] = w_((c_o * m,))
    p["proj_w"] = w_((c_o * m, m, f, f))              # torch grouped-conv layout
    p["proj_b"] = w_((c_o * m,))
    return p


# ----------------------------------------------------------------------------
# BankEncoder forward
# ----------------------------------------------------------------------------
def bank_encoder_forward(x_nchw, params, cfg):
    r_list = cfg["sampling_ratio_list"]
    c_o = cfg["num_proj_channels"]
    m = cfg["num_code_maps"]
    f = cfg["proj_filter_size"]
    k = cfg["k"]
    nb = len(r_list)

    b, c, h, w = x_nchw.shape
    # (C, B, H, W): the big flattened B*H*W axis stays last (lane-dense)
    # through every kernel; intermediate activations are stored in bf16.
    inp = jnp.transpose(x_nchw, (1, 0, 2, 3)).astype(jnp.bfloat16)
    res_list = []
    for i in range(nb):
        res_list.append(down_block_ext(inp, params["ext"][i], prod(r_list[i:])))
        inp = down_block_int(inp, params["int"][i], r_list[i])
    res = jnp.concatenate(res_list + [inp], axis=0)       # channel-axis cat

    # conv_channel: 1x1 conv == plain matmul over the channel axis.
    Ccat, Bc, Hc, Wc = res.shape
    cc_w = params["cc_w"].reshape(c_o * m, Ccat)
    cc = matmul_bias(cc_w, res.reshape(Ccat, Bc * Hc * Wc), params["cc_b"],
                     act="none", out_dtype=jnp.bfloat16)
    cc = cc.reshape(c_o * m, Bc, Hc, Wc)

    # ---- ConvIndexer ----
    # TODO(synk): Dropout2d and BatchNorm2d use eval-mode (deterministic)
    # semantics; training-mode stochasticity / batch statistics are omitted.
    proj = grouped_conv_proj(cc, params["proj_w"], params["proj_b"],
                             f=f, stride=f // 4, groups=c_o,
                             out_dtype=jnp.float32)        # (c_o, m, B*OH*OW)
    stride = f // 4
    OH = (Hc - f) // stride + 1
    OW = (Wc - f) // stride + 1
    # Already column-ordered (m, B, OH, OW) for the per-column top-k over c_o:
    # no transposes / 'five' / 'flat' materialisation needed.
    flat = proj.reshape(c_o, m * Bc * OH * OW)
    pv, pi, nv, ni = topk_pos_neg(flat, k)

    def unflat(a):
        return jnp.transpose(a.reshape(k, m, Bc, OH, OW), (2, 0, 1, 3, 4))

    code = {"pos": {"ind": unflat(pi), "val": unflat(pv)},
            "neg": {"ind": unflat(ni), "val": unflat(nv)}}

    stats = {
        "rate_actual": 2 * m * (m * OH * OW) * log2(c_o),
        "rate_ideal": m * (OH * OW) * log2(comb(c_o, 2 * k)),
    }
    # NOTE: matches the torch expression `rate / h * w` verbatim.
    stats["bpp_actual"] = stats["rate_actual"] / h * w
    stats["bpp_ideal"] = stats["rate_ideal"] / h * w
    return code, stats


# ----------------------------------------------------------------------------
if __name__ == "__main__":
    cfg = dict(
        sampling_ratio_list=[2, 2],
        channels_list=[4, 8, 8],
        num_proj_channels=8,
        proj_filter_size=4,
        k=2,
        num_code_maps=2,
        dropout=0.0,
    )
    key = jax.random.PRNGKey(0)
    kp, kx = jax.random.split(key)
    params = init_bank_encoder_params(kp, cfg)
    x = jax.random.normal(kx, (2, 4, 16, 16), jnp.float32)   # NCHW like torch

    code, stats = bank_encoder_forward(x, params, cfg)
    jax.tree_util.tree_map(lambda a: a.block_until_ready(), code)
    print("KERNEL_OK")
</pallas_src>

<mosaic_0001>
module attributes {stable_mosaic.version = 11 : i64} {
  func.func @kernel(%arg0: i32, %arg1: i32, %arg2: memref<4x40xbf16, #tpu.memory_space<vmem>>, %arg3: memref<40x512xbf16, #tpu.memory_space<vmem>>, %arg4: memref<4x1xf32, #tpu.memory_space<vmem>>, %arg5: memref<4x512xbf16, #tpu.memory_space<vmem>>, %arg6: memref<4x512xf32, #tpu.memory_space<vmem>>) attributes {dimension_semantics = [#tpu.dimension_semantics<parallel>, #tpu.dimension_semantics<arbitrary>], iteration_bounds = array<i64: 1, 1>, scalar_prefetch = 0 : i64, scratch_operands = 1 : i64, tpu.core_type = #tpu.core_type<tc>, window_params = [{transform_indices = @transform_0, window_bounds = array<i64: 4, 40>}, {transform_indices = @transform_1, window_bounds = array<i64: 40, 512>}, {pipeline_mode = #tpu.pipeline_mode<synchronous>, transform_indices = @transform_2, window_bounds = array<i64: 4, 1>}, {transform_indices = @transform_3, window_bounds = array<i64: 4, 512>}]} {
    %c0_i32 = arith.constant 0 : i32
    %0 = arith.cmpi eq, %arg1, %c0_i32 : i32
    %1 = arith.extui %0 : i1 to i32
    %c0_i32_0 = arith.constant 0 : i32
    %2 = arith.cmpi ne, %1, %c0_i32_0 : i32
    scf.if %2 {
      %cst_10 = arith.constant 0.000000e+00 : f32
      %12 = vector.broadcast %cst_10 : f32 to vector<4x512xf32>
      %c0_11 = arith.constant 0 : index
      %c0_12 = arith.constant 0 : index
      %13 = vector.load %arg6[%c0_11, %c0_12] : memref<4x512xf32, #tpu.memory_space<vmem>>, vector<4x512xf32>
      tpu.vector_store %arg6[%c0_11, %c0_12], %12 {strides = array<i32>} : memref<4x512xf32, #tpu.memory_space<vmem>>, vector<4x512xf32>,
    } else {
    }
    %c0 = arith.constant 0 : index
    %c0_1 = arith.constant 0 : index
    %3 = vector.load %arg6[%c0, %c0_1] : memref<4x512xf32, #tpu.memory_space<vmem>>, vector<4x512xf32>
    %c0_2 = arith.constant 0 : index
    %c0_3 = arith.constant 0 : index
    %4 = vector.load %arg2[%c0_2, %c0_3] : memref<4x40xbf16, #tpu.memory_space<vmem>>, vector<4x40xbf16>
    %c0_4 = arith.constant 0 : index
    %c0_5 = arith.constant 0 : index
    %5 = vector.load %arg3[%c0_4, %c0_5] : memref<40x512xbf16, #tpu.memory_space<vmem>>, vector<40x512xbf16>
    %cst = arith.constant dense<0.000000e+00> : vector<4x512xf32>
    %6 = tpu.matmul %4, %5, %cst {dimension_numbers = #tpu.dot_dimension_numbers<[1], [0], [0], [1], [0, 0, 1, 1], [], []>} : vector<4x40xbf16>, vector<40x512xbf16>, vector<4x512xf32> -> vector<4x512xf32>
    %7 = arith.addf %3, %6 : vector<4x512xf32>
    %c0_6 = arith.constant 0 : index
    %c0_7 = arith.constant 0 : index
    %8 = vector.load %arg6[%c0_6, %c0_7] : memref<4x512xf32, #tpu.memory_space<vmem>>, vector<4x512xf32>
    tpu.vector_store %arg6[%c0_6, %c0_7], %7 {strides = array<i32>} : memref<4x512xf32, #tpu.memory_space<vmem>>, vector<4x512xf32>,
    %c0_i32_8 = arith.constant 0 : i32
    %9 = arith.cmpi eq, %arg1, %c0_i32_8 : i32
    %10 = arith.extui %9 : i1 to i32
    %c0_i32_9 = arith.constant 0 : i32
    %11 = arith.cmpi ne, %10, %c0_i32_9 : i32
    scf.if %11 {
      %c0_10 = arith.constant 0 : index
      %c0_11 = arith.constant 0 : index
      %12 = vector.load %arg6[%c0_10, %c0_11] : memref<4x512xf32, #tpu.memory_space<vmem>>, vector<4x512xf32>
      %c0_12 = arith.constant 0 : index
      %c0_13 = arith.constant 0 : index
      %13 = vector.load %arg4[%c0_12, %c0_13] : memref<4x1xf32, #tpu.memory_space<vmem>>, vector<4x1xf32>
      %14 = vector.broadcast %13 : vector<4x1xf32> to vector<4x512xf32>
      %15 = arith.addf %12, %14 : vector<4x512xf32>
      %cst_14 = arith.constant 0.000000e+00 : f32
      %16 = vector.broadcast %cst_14 : f32 to vector<4x512xf32>
      %17 = arith.cmpf oge, %15, %16 : vector<4x512xf32>
      %cst_15 = arith.constant 0.00999999977 : f32
      %18 = vector.broadcast %cst_15 : f32 to vector<4x512xf32>
      %19 = arith.mulf %18, %15 : vector<4x512xf32>
      %20 = arith.select %17, %15, %19 : vector<4x512xi1>, vector<4x512xf32>
      %21 = arith.truncf %20 : vector<4x512xf32> to vector<4x512xbf16>
      %c0_16 = arith.constant 0 : index
      %c0_17 = arith.constant 0 : index
      %22 = vector.load %arg5[%c0_16, %c0_17] : memref<4x512xbf16, #tpu.memory_space<vmem>>, vector<4x512xbf16>
      tpu.vector_store %arg5[%c0_16, %c0_17], %21 {strides = array<i32>} : memref<4x512xbf16, #tpu.memory_space<vmem>>, vector<4x512xbf16>,
    } else {
    }
    return
  }
  func.func @transform_0(%arg0: i32, %arg1: i32) -> (i32, i32) {
    %c0_i32 = arith.constant 0 : i32
    %c0_i32_0 = arith.constant 0 : i32
    return %c0_i32, %arg1 : i32, i32
  }
  func.func @transform_1(%arg0: i32, %arg1: i32) -> (i32, i32) {
    %c0_i32 = arith.constant 0 : i32
    return %arg1, %arg0 : i32, i32
  }
  func.func @transform_2(%arg0: i32, %arg1: i32) -> (i32, i32) {
    %c0_i32 = arith.constant 0 : i32
    %c0_i32_0 = arith.constant 0 : i32
    %c0_i32_1 = arith.constant 0 : i32
    return %c0_i32, %c0_i32_0 : i32, i32
  }
  func.func @transform_3(%arg0: i32, %arg1: i32) -> (i32, i32) {
    %c0_i32 = arith.constant 0 : i32
    %c0_i32_0 = arith.constant 0 : i32
    return %c0_i32, %arg0 : i32, i32
  }
}

</mosaic_0001>

<bundles_post_ra>
// kernel: tpu_custom_call.1
= control target key start
LH: loop header
LB: loop body
LE: loop exit
PB: predicated region body
PF: predicated region fallthrough
CT: control target
= control target key end

     0   :  { %8 = vsyncpa [#allocation4], 0  ;;  %s431_s0 = inlined_call_operand.vmem [shape: bf16[4,40], index: 0, kind: input, shape index: {}]   ;;  %s432_s1 = inlined_call_operand.hbm [shape: bf16[40,512], index: 1, kind: input, shape index: {}]   ;;  %s433_s2 = inlined_call_operand.vmem [shape: f32[4,1], index: 2, kind: input, shape index: {}]   ;;  %s434_s3 = inlined_call_operand.hbm [shape: bf16[4,512], index: 3, kind: output, shape index: {}]  }
   0x1   :  { %9 = vsyncpa [#allocation5], 0  ;;  %s374_s12 = smov [#allocation3]   ;;  %s326_s16 = scalar_lea.hbm %s432_s1, 1280 }
   0x2   :  { %s17_s13 = sshll.u32 %s374_s12, 4  ;;  %p327_p0 = scmp.ne.s32.totalorder %s432_s1, %s326_s16  ;;  %s18_s13 = int_to_ptr.vmem [resolvable:$true] %s17_s13 }
   0x3   :  { %p330_p1 = scmp.lt.u32.totalorder %s326_s16, %s432_s1 }
   0x5   :  { %p332_p2 = pnand %p330_p1, %p327_p0 }
   0x7   :  { %335 = shalt.err (!%p332_p2)
}
   0x8   :  { %s336_s21 = scalar_lea.vmem %s18_s13, 1280  ;;  %p341_p4 = scmp.lt.s32.totalorder %s18_s13, %s18_s13 }
   0x9   :  { %p337_p3 = scmp.ne.s32.totalorder %s18_s13, %s336_s21  ;;  %p342_p5 = scmp.lt.s32.totalorder %s336_s21, %s336_s21 }
   0xb   :  { %p343_p6 = por %p342_p5, %p341_p4 }
   0xd   :  { %p344_p7 = pnand %p343_p6, %p337_p3 }
   0xf   :  { %347 = shalt.err (!%p344_p7)
}
  0x10   :  { %s375_s22 = smov 256   ;;  %s376_s23 = smov 16  }
  0x11   :  { %23 = dma.hbm_to_vmem [thread:$0]  %s432_s1, 1280, %s18_s13, [#allocation4], %s375_s22, %s375_s22, %s376_s23  }
  0x12   :  { %370 = dma.done.wait [#allocation4], 1280  }
  0x13   :  { %371 = vsyncadd [#allocation4], 4294966016  ;;  %v377_v0 = vmov 0   ;;  %v310_v1 = vld [vmem:[#allocation3 + $0x4] ss:$16 sps:$4 sm:$0xff]   ;;  %vm103_vm0 = vcmask 1043456   ;;  %v223_v21 = vlaneseq }
  0x14   :  { %148 = vmatprep.mubr.bf16.mxu0 %v377_v0  ;;  %189 = vmatprep.mubr.bf16.mxu1 %v377_v0  ;;  %v312_v2 = vld [vmem:[#allocation3 + $0xc] ss:$16 sps:$4 sm:$0xff]   ;;  %v314_v3 = vld [vmem:[#allocation3] ss:$16 sps:$4 sm:$0xff]   ;;  %v315_v4 = vld [vmem:[#allocation3 + $0x8] ss:$16 sps:$4 sm:$0xff]  }
  0x15   :  { %309 = vset.pattern.permute.xlu0 %v377_v0  ;;  %116 = vmatprep.subr.bf16.mxu0 %v310_v1  ;;  %v316_v5 = vld [vmem:[#allocation3 + $0x24] ss:$16 sps:$4 sm:$0xff]   ;;  %v318_v6 = vld [vmem:[#allocation3 + $0x2c] ss:$16 sps:$4 sm:$0xff]   ;;  %v320_v7 = vld [vmem:[#allocation3 + $0x20] ss:$16 sps:$4 sm:$0xff]  }
  0x16   :  { %157 = vmatprep.subr.bf16.mxu1 %v312_v2  ;;  %117 = vmatpush1.bf16.msra.mxu0 %v314_v3  ;;  %v321_v8 = vld [vmem:[#allocation3 + $0x28] ss:$16 sps:$4 sm:$0xff]   ;;  %v47_v9 = vld [vmem:[#allocation3 + $0x40] sm:$0xff]  ;;  %vm99_vm1 = vcmask 326656   ;;  %v378_v19 = vmov 839922192  }
  0x17   :  { %158 = vmatpush1.bf16.msra.mxu1 %v315_v4  ;;  %118 = vmatprep.subr.bf16.mxu0 %v316_v5  ;;  %v48_v10 = vld [vmem:[#allocation3 + $0x48] sm:$0xff]  ;;  %v293_v11 = vcombine.high %v47_v9, %v47_v9  ;;  %v292_v13 = vcombine.low %v47_v9, %v47_v9  ;;  %v215_v15 = vld [vmem:[%s433_s2] sm:$0xf]  ;;  %v221_v20 = vunpack.c.l.s4 %v378_v19  ;;  %v224_v23 = vshrl.u32 %v223_v21, 7 }
  0x18   :  { %159 = vmatprep.subr.bf16.mxu1 %v318_v6  ;;  %v295_v12 = vcombine.high %v48_v10, %v48_v10  ;;  %v294_v14 = vcombine.low %v48_v10, %v48_v10  ;;  %218 = vperm.xlu0 %309, %v215_v15   ;;  %v38_v18 = vld [vmem:[%s431_s0] sm:$0x3]  ;;  %v379_v29 = vmov 1983009808   ;;  %s380_s0 = smov [#allocation6]  }
  0x19   :  { %v105_v16 = vsel %vm103_vm0, %v292_v13, 0  ;;  %v222_v22 = vunpack.c.0.s8 %v221_v20  ;;  %v253_v30 = vunpack.c.l.s4 %v379_v29  ;;  %s275_s2 = sshll.u32 %s380_s0, 4  ;;  %s276_s2 = int_to_ptr.vmem [resolvable:$true] %s275_s2 }
  0x1a   :  { %119 = vmatpush1.bf16.msra.mxu0 %v320_v7  ;;  %v111_v17 = vsel %vm103_vm0, %v294_v14, 0  ;;  %s348_s29 = scalar_lea.vmem %s276_s2, 128  ;;  %p353_p9 = scmp.lt.s32.totalorder %s276_s2, %s276_s2 }
  0x1b   :  { %160 = vmatpush1.bf16.msra.mxu1 %v321_v8  ;;  %296 = vmatprep.subr.msk.bf16.mxu0 %vm103_vm0, %v293_v11  ;;  %v225_v24 = vsub.s32 %v222_v22, %v224_v23  ;;  %v254_v41 = vunpack.c.0.s8 %v253_v30  ;;  %p349_p8 = scmp.ne.s32.totalorder %s276_s2, %s348_s29  ;;  %p354_p10 = scmp.lt.s32.totalorder %s348_s29, %s348_s29 }
  0x1c   :  { %298 = vmatprep.subr.msk.bf16.mxu1 %vm103_vm0, %v295_v12 }
  0x1d   :  { %v257_v46 = vsub.s32 %v254_v41, %v224_v23  ;;  %p355_p11 = por %p354_p10, %p353_p9 }
  0x1e   :  { %121 = vmatpush1.bf16.msra.mxu0 %v105_v16 }
  0x1f   :  { %162 = vmatpush1.bf16.msra.mxu1 %v111_v17  ;;  %p356_p12 = pnand %p355_p11, %p349_p8 }
  0x21   :  { %297 = vmatmul.mubr.msk.bf16.vlgmr.msra.gmra.mrb[0].mxu0 %vm99_vm1, %v38_v18 }
  0x22   :  { %299 = vmatmul.mubr.msk.bf16.vlgmr.msra.gmra.mrb[0].mxu1 %vm99_vm1, %v38_v18 }
  0x97   :  { %v219_v25 = vpop.permute.xlu0 %218 }
  0x98   :  { %v226_v28 = vrot.slane %v219_v25, %v225_v24 }
  0xf4   :  { %v150_v26 = vpop.f32.mrb[0].mxu0 }
  0xf5   :  { %v191_v27 = vpop.f32.mrb[0].mxu1  ;;  %v152_v31 = vpop.f32.mrb[1].mxu0 }
  0xf6   :  { %v193_v32 = vpop.f32.mrb[1].mxu1  ;;  %v202_v33 = vcombine.low %v150_v26, %v152_v31  ;;  %v154_v35 = vpop.f32.mrb[2].mxu0 }
  0xf7   :  { %v203_v34 = vcombine.low %v191_v27, %v193_v32  ;;  %v195_v36 = vpop.f32.mrb[2].mxu1  ;;  %v155_v37 = vpop.f32.mrb[3].mxu0 }
  0xf8   :  { %v196_v38 = vpop.f32.mrb[3].mxu1  ;;  %v228_v39 = vadd.f32 %v226_v28, %v202_v33 }
  0xf9   :  { %v229_v40 = vadd.f32 %v226_v28, %v203_v34 }
  0xfa   :  { %vm230_vm2 = vcmp.ge.f32.partialorder %v228_v39, 0.0  ;;  %v232_v42 = vmul.f32 0.01, %v228_v39 }
  0xfb   :  { %vm231_vm3 = vcmp.ge.f32.partialorder %v229_v40, 0.0  ;;  %v233_v43 = vmul.f32 0.01, %v229_v40 }
  0xfc   :  { %v234_v44 = vsel %vm230_vm2, %v228_v39, %v232_v42 }
  0xfd   :  { %v235_v45 = vsel %vm231_vm3, %v229_v40, %v233_v43  ;;  %v238_v47 = vcombine.high %v234_v44, %v234_v44 }
  0xfe   :  { %v239_v48 = vcombine.high %v235_v45, %v235_v45 }
  0xff   :  { %v300_v49 = vpack.c.bf16 %v238_v47, %v234_v44 }
 0x100   :  { %v301_v50 = vpack.c.bf16 %v239_v48, %v235_v45 }
 0x101   :  { %v258_v51 = vrot.slane %v300_v49, %v257_v46 }
 0x102   :  { %v265_v52 = vrot.slane %v301_v50, %v257_v46 }
 0x104   :  { %v266_v53 = vcombine.low %v258_v51, %v265_v52 }
 0x106   :  { %268 = vst [vmem:[#allocation6] sm:$0xff] %v266_v53 }
 0x107   :  { %359 = shalt.err (!%p356_p12)
}
 0x108   :  { %s360_s5 = scalar_lea.hbm %s434_s3, 128 }
 0x109   :  { %p361_p13 = scmp.ne.s32.totalorder %s434_s3, %s360_s5  ;;  %p364_p0 = scmp.lt.u32.totalorder %s360_s5, %s434_s3 }
 0x10b   :  { %p366_p1 = pnand %p364_p0, %p361_p13 }
 0x10d   :  { %369 = shalt.err (!%p366_p1)
}
 0x10e   :  { %278 = dma.vmem_to_hbm [thread:$0]  %s276_s2, 128, %s434_s3, [#allocation5]  }
 0x10f   :  { %372 = dma.done.wait [#allocation5], 128  }
 0x110   :  { %373 = vsyncadd [#allocation5], 4294967168 }
 0x111   :  { %282 = vsyncpa [#allocation4], 1 }
 0x112   :  { %283 = vsyncpa [#allocation5], 1 }

</bundles_post_ra>
